<compile_context>
chip_gen: v5e
topology: v5e:2x2
jax: 0.10.0
libtpu: 0.0.40
codegen_flags: <defaults>
</compile_context>

<pallas_src>
import functools

import jax
import jax.numpy as jnp
from jax.experimental import pallas as pl
from jax.experimental.pallas import tpu as pltpu

LANE = 128      # lane width
SUBLANE = 8     # f32 sublane granule


def _round_up(n, m):
    return ((n + m - 1) // m) * m


def _mlp_kernel(x_ref, w1_ref, b1_ref, w2_ref, b2_ref, w3_ref, b3_ref, o_ref):
    # Layer 1: bf16 matmul on the MXU with f32 accumulation; bias + ReLU in f32.
    h = jnp.dot(x_ref[...], w1_ref[...], preferred_element_type=jnp.float32)
    h = jnp.maximum(h + b1_ref[...], 0.0)
    # Dropout(0.1) -> identity at inference.
    # Layer 2: Linear + ReLU.
    h = jnp.dot(h.astype(jnp.bfloat16), w2_ref[...],
                preferred_element_type=jnp.float32)
    h = jnp.maximum(h + b2_ref[...], 0.0)
    # Layer 3: Linear (logits).
    out = jnp.dot(h.astype(jnp.bfloat16), w3_ref[...],
                  preferred_element_type=jnp.float32)
    o_ref[...] = (out + b3_ref[...]).astype(o_ref.dtype)


@functools.partial(jax.jit, static_argnames=("max_tile",))
def policy_network_forward(x, params, *, max_tile=512):
    """Fused 3-layer MLP forward.  x: [B, input_dim] float32."""
    w1, b1, w2, b2, w3, b3 = params            # [in, out] layout, f32, unpadded
    B, input_dim = x.shape
    hidden = w1.shape[1]
    out_dim = w3.shape[1]

    # Lane-dense padding of hidden / output feature dims (zero-pad -> exact).
    hidden_p = _round_up(hidden, LANE)
    out_p = _round_up(out_dim, LANE)

    def pad2(a, rows, cols):
        return jnp.pad(a, ((0, rows - a.shape[0]), (0, cols - a.shape[1])))

    w1p = pad2(w1, input_dim, hidden_p).astype(jnp.bfloat16)
    b1p = pad2(b1, 1, hidden_p)                              # f32
    w2p = pad2(w2, hidden_p, hidden_p).astype(jnp.bfloat16)
    b2p = pad2(b2, 1, hidden_p)                              # f32
    w3p = pad2(w3, hidden_p, out_p).astype(jnp.bfloat16)
    b3p = pad2(b3, 1, out_p)                                 # f32

    # Batch tile: multiple of the 8-row sublane granule, capped at max_tile.
    tb = min(max_tile, _round_up(B, SUBLANE))
    b_pad = _round_up(B, tb)
    xp = jnp.pad(x, ((0, b_pad - B), (0, 0))).astype(jnp.bfloat16)

    grid = (b_pad // tb,)
    const = lambda shape: pl.BlockSpec(shape, lambda i: (0, 0))

    flops = 2 * b_pad * (input_dim * hidden_p + hidden_p * hidden_p
                         + hidden_p * out_p)
    bytes_accessed = (xp.size * 2
                      + (w1p.size + w2p.size + w3p.size) * 2
                      + (b1p.size + b2p.size + b3p.size) * 4
                      + b_pad * out_p * 4)

    out = pl.pallas_call(
        _mlp_kernel,
        out_shape=jax.ShapeDtypeStruct((b_pad, out_p), jnp.float32),
        grid_spec=pltpu.PrefetchScalarGridSpec(
            num_scalar_prefetch=0,
            grid=grid,
            in_specs=[
                pl.BlockSpec((tb, input_dim), lambda i: (i, 0)),   # x tile
                const((input_dim, hidden_p)),                      # w1 (resident)
                const((1, hidden_p)),                              # b1
                const((hidden_p, hidden_p)),                       # w2
                const((1, hidden_p)),                              # b2
                const((hidden_p, out_p)),                          # w3
                const((1, out_p)),                                 # b3
            ],
            out_specs=pl.BlockSpec((tb, out_p), lambda i: (i, 0)),
        ),
        compiler_params=pltpu.CompilerParams(
            dimension_semantics=("parallel",)),
        cost_estimate=pl.CostEstimate(flops=flops, transcendentals=0,
                                      bytes_accessed=bytes_accessed),
    )(xp, w1p, b1p, w2p, b2p, w3p, b3p)

    return out[:B, :out_dim]


def init_params(key, input_dim, output_dim, hidden_dim=64):
    """Deterministic parameter init (shapes match the PyTorch module)."""
    ks = jax.random.split(key, 6)

    def uniform(k, shape, fan_in):
        bound = 1.0 / jnp.sqrt(fan_in)
        return jax.random.uniform(k, shape, jnp.float32, -bound, bound)

    # Stored as [in, out] (transpose of PyTorch's [out, in]); biases 2D [1, out].
    w1 = uniform(ks[0], (input_dim, hidden_dim), input_dim)
    b1 = uniform(ks[1], (1, hidden_dim), input_dim)
    w2 = uniform(ks[2], (hidden_dim, hidden_dim), hidden_dim)
    b2 = uniform(ks[3], (1, hidden_dim), hidden_dim)
    w3 = uniform(ks[4], (hidden_dim, output_dim), hidden_dim)
    b3 = uniform(ks[5], (1, output_dim), hidden_dim)
    return (w1, b1, w2, b2, w3, b3)


def reference_forward(x, params):
    """Same math (bf16 inputs/weights, f32 accumulation) in plain JAX."""
    w1, b1, w2, b2, w3, b3 = params
    bf = jnp.bfloat16
    h = jnp.dot(x.astype(bf), w1.astype(bf), preferred_element_type=jnp.float32)
    h = jnp.maximum(h + b1, 0.0)
    h = jnp.dot(h.astype(bf), w2.astype(bf), preferred_element_type=jnp.float32)
    h = jnp.maximum(h + b2, 0.0)
    return jnp.dot(h.astype(bf), w3.astype(bf),
                   preferred_element_type=jnp.float32) + b3


if __name__ == "__main__":
    key = jax.random.PRNGKey(0)
    k_x, k_p = jax.random.split(key)

    batch, input_dim, hidden_dim, output_dim = 2, 16, 64, 8
    x = jax.random.normal(k_x, (batch, input_dim), jnp.float32)
    params = init_params(k_p, input_dim, output_dim, hidden_dim)

    out = policy_network_forward(x, params)
    out = jax.block_until_ready(out)

    ref = reference_forward(x, params)
    assert out.shape == (batch, output_dim)
    assert jnp.allclose(out, ref, atol=1e-2, rtol=1e-2), (
        float(jnp.max(jnp.abs(out - ref))))

    print("KERNEL_OK")
</pallas_src>

<mosaic_0001>
module attributes {stable_mosaic.version = 11 : i64} {
  func.func @_mlp_kernel(%arg0: i32, %arg1: memref<8x16xbf16, #tpu.memory_space<vmem>>, %arg2: memref<16x128xbf16, #tpu.memory_space<vmem>>, %arg3: memref<1x128xf32, #tpu.memory_space<vmem>>, %arg4: memref<128x128xbf16, #tpu.memory_space<vmem>>, %arg5: memref<1x128xf32, #tpu.memory_space<vmem>>, %arg6: memref<128x128xbf16, #tpu.memory_space<vmem>>, %arg7: memref<1x128xf32, #tpu.memory_space<vmem>>, %arg8: memref<8x128xf32, #tpu.memory_space<vmem>>) attributes {dimension_semantics = [#tpu.dimension_semantics<parallel>], iteration_bounds = array<i64: 1>, scalar_prefetch = 0 : i64, scratch_operands = 0 : i64, tpu.core_type = #tpu.core_type<tc>, window_params = [{transform_indices = @transform_0, window_bounds = array<i64: 8, 16>}, {pipeline_mode = #tpu.pipeline_mode<synchronous>, transform_indices = @transform_1, window_bounds = array<i64: 16, 128>}, {pipeline_mode = #tpu.pipeline_mode<synchronous>, transform_indices = @transform_2, window_bounds = array<i64: 1, 128>}, {pipeline_mode = #tpu.pipeline_mode<synchronous>, transform_indices = @transform_3, window_bounds = array<i64: 128, 128>}, {pipeline_mode = #tpu.pipeline_mode<synchronous>, transform_indices = @transform_4, window_bounds = array<i64: 1, 128>}, {pipeline_mode = #tpu.pipeline_mode<synchronous>, transform_indices = @transform_5, window_bounds = array<i64: 128, 128>}, {pipeline_mode = #tpu.pipeline_mode<synchronous>, transform_indices = @transform_6, window_bounds = array<i64: 1, 128>}, {transform_indices = @transform_7, window_bounds = array<i64: 8, 128>}]} {
    %c0 = arith.constant 0 : index
    %c0_0 = arith.constant 0 : index
    %0 = vector.load %arg1[%c0, %c0_0] : memref<8x16xbf16, #tpu.memory_space<vmem>>, vector<8x16xbf16>
    %c0_1 = arith.constant 0 : index
    %c0_2 = arith.constant 0 : index
    %1 = vector.load %arg2[%c0_1, %c0_2] : memref<16x128xbf16, #tpu.memory_space<vmem>>, vector<16x128xbf16>
    %cst = arith.constant dense<0.000000e+00> : vector<8x128xf32>
    %2 = tpu.matmul %0, %1, %cst {dimension_numbers = #tpu.dot_dimension_numbers<[1], [0], [0], [1], [0, 0, 1, 1], [], []>} : vector<8x16xbf16>, vector<16x128xbf16>, vector<8x128xf32> -> vector<8x128xf32>
    %c0_3 = arith.constant 0 : index
    %c0_4 = arith.constant 0 : index
    %3 = vector.load %arg3[%c0_3, %c0_4] : memref<1x128xf32, #tpu.memory_space<vmem>>, vector<1x128xf32>
    %4 = vector.broadcast %3 : vector<1x128xf32> to vector<8x128xf32>
    %5 = arith.addf %2, %4 : vector<8x128xf32>
    %cst_5 = arith.constant 0.000000e+00 : f32
    %6 = vector.broadcast %cst_5 : f32 to vector<8x128xf32>
    %7 = arith.maximumf %5, %6 : vector<8x128xf32>
    %8 = arith.truncf %7 : vector<8x128xf32> to vector<8x128xbf16>
    %c0_6 = arith.constant 0 : index
    %c0_7 = arith.constant 0 : index
    %9 = vector.load %arg4[%c0_6, %c0_7] : memref<128x128xbf16, #tpu.memory_space<vmem>>, vector<128x128xbf16>
    %cst_8 = arith.constant dense<0.000000e+00> : vector<8x128xf32>
    %10 = tpu.matmul %8, %9, %cst_8 {dimension_numbers = #tpu.dot_dimension_numbers<[1], [0], [0], [1], [0, 0, 1, 1], [], []>} : vector<8x128xbf16>, vector<128x128xbf16>, vector<8x128xf32> -> vector<8x128xf32>
    %c0_9 = arith.constant 0 : index
    %c0_10 = arith.constant 0 : index
    %11 = vector.load %arg5[%c0_9, %c0_10] : memref<1x128xf32, #tpu.memory_space<vmem>>, vector<1x128xf32>
    %12 = vector.broadcast %11 : vector<1x128xf32> to vector<8x128xf32>
    %13 = arith.addf %10, %12 : vector<8x128xf32>
    %cst_11 = arith.constant 0.000000e+00 : f32
    %14 = vector.broadcast %cst_11 : f32 to vector<8x128xf32>
    %15 = arith.maximumf %13, %14 : vector<8x128xf32>
    %16 = arith.truncf %15 : vector<8x128xf32> to vector<8x128xbf16>
    %c0_12 = arith.constant 0 : index
    %c0_13 = arith.constant 0 : index
    %17 = vector.load %arg6[%c0_12, %c0_13] : memref<128x128xbf16, #tpu.memory_space<vmem>>, vector<128x128xbf16>
    %cst_14 = arith.constant dense<0.000000e+00> : vector<8x128xf32>
    %18 = tpu.matmul %16, %17, %cst_14 {dimension_numbers = #tpu.dot_dimension_numbers<[1], [0], [0], [1], [0, 0, 1, 1], [], []>} : vector<8x128xbf16>, vector<128x128xbf16>, vector<8x128xf32> -> vector<8x128xf32>
    %c0_15 = arith.constant 0 : index
    %c0_16 = arith.constant 0 : index
    %19 = vector.load %arg7[%c0_15, %c0_16] : memref<1x128xf32, #tpu.memory_space<vmem>>, vector<1x128xf32>
    %20 = vector.broadcast %19 : vector<1x128xf32> to vector<8x128xf32>
    %21 = arith.addf %18, %20 : vector<8x128xf32>
    %c0_17 = arith.constant 0 : index
    %c0_18 = arith.constant 0 : index
    %22 = vector.load %arg8[%c0_17, %c0_18] : memref<8x128xf32, #tpu.memory_space<vmem>>, vector<8x128xf32>
    tpu.vector_store %arg8[%c0_17, %c0_18], %21 {strides = array<i32>} : memref<8x128xf32, #tpu.memory_space<vmem>>, vector<8x128xf32>,
    return
  }
  func.func @transform_0(%arg0: i32) -> (i32, i32) {
    %c0_i32 = arith.constant 0 : i32
    %c0_i32_0 = arith.constant 0 : i32
    return %arg0, %c0_i32 : i32, i32
  }
  func.func @transform_1(%arg0: i32) -> (i32, i32) {
    %c0_i32 = arith.constant 0 : i32
    %c0_i32_0 = arith.constant 0 : i32
    %c0_i32_1 = arith.constant 0 : i32
    return %c0_i32, %c0_i32_0 : i32, i32
  }
  func.func @transform_2(%arg0: i32) -> (i32, i32) {
    %c0_i32 = arith.constant 0 : i32
    %c0_i32_0 = arith.constant 0 : i32
    %c0_i32_1 = arith.constant 0 : i32
    return %c0_i32, %c0_i32_0 : i32, i32
  }
  func.func @transform_3(%arg0: i32) -> (i32, i32) {
    %c0_i32 = arith.constant 0 : i32
    %c0_i32_0 = arith.constant 0 : i32
    %c0_i32_1 = arith.constant 0 : i32
    return %c0_i32, %c0_i32_0 : i32, i32
  }
  func.func @transform_4(%arg0: i32) -> (i32, i32) {
    %c0_i32 = arith.constant 0 : i32
    %c0_i32_0 = arith.constant 0 : i32
    %c0_i32_1 = arith.constant 0 : i32
    return %c0_i32, %c0_i32_0 : i32, i32
  }
  func.func @transform_5(%arg0: i32) -> (i32, i32) {
    %c0_i32 = arith.constant 0 : i32
    %c0_i32_0 = arith.constant 0 : i32
    %c0_i32_1 = arith.constant 0 : i32
    return %c0_i32, %c0_i32_0 : i32, i32
  }
  func.func @transform_6(%arg0: i32) -> (i32, i32) {
    %c0_i32 = arith.constant 0 : i32
    %c0_i32_0 = arith.constant 0 : i32
    %c0_i32_1 = arith.constant 0 : i32
    return %c0_i32, %c0_i32_0 : i32, i32
  }
  func.func @transform_7(%arg0: i32) -> (i32, i32) {
    %c0_i32 = arith.constant 0 : i32
    %c0_i32_0 = arith.constant 0 : i32
    return %arg0, %c0_i32 : i32, i32
  }
}

</mosaic_0001>

<bundles_post_ra>
// kernel: policy_network_forward.1
= control target key start
LH: loop header
LB: loop body
LE: loop exit
PB: predicated region body
PF: predicated region fallthrough
CT: control target
= control target key end

     0   :  { %vm40_vm0 = vcmask 130048   ;;  %s423_s1 = inlined_call_operand.vmem [shape: bf16[16,128], index: 1, kind: input, shape index: {}]   ;;  %s424_s0 = inlined_call_operand.vmem [shape: bf16[8,16], index: 0, kind: input, shape index: {}]   ;;  %s425_s3 = inlined_call_operand.vmem [shape: bf16[128,128], index: 3, kind: input, shape index: {}]   ;;  %s426_s2 = inlined_call_operand.vmem [shape: f32[1,128], index: 2, kind: input, shape index: {}]   ;;  %s427_s4 = inlined_call_operand.vmem [shape: f32[1,128], index: 4, kind: input, shape index: {}]   ;;  %s428_s5 = inlined_call_operand.vmem [shape: bf16[128,128], index: 5, kind: input, shape index: {}]   ;;  %s429_s6 = inlined_call_operand.vmem [shape: f32[1,128], index: 6, kind: input, shape index: {}]   ;;  %s430_s7 = inlined_call_operand.vmem [shape: f32[8,128], index: 7, kind: output, shape index: {}]  }
   0x1   :  { %v297_v0 = vld [vmem:[%s423_s1] sm:$0xff]  ;;  %v305_v1 = vld [vmem:[%s425_s3 + $0x38] sm:$0xff]  ;;  %v304_v3 = vld [vmem:[%s425_s3 + $0x30] sm:$0xff] }
   0x2   :  { %51 = vmatpush.bf16.msra.mxu0 %v297_v0  ;;  %v27_v2 = vld [vmem:[%s424_s0] sm:$0xf]  ;;  %127 = vmatpush.bf16.msra.mxu1 %v305_v1  ;;  %v303_v4 = vld [vmem:[%s425_s3 + $0x28] sm:$0xff]  ;;  %v301_v6 = vld [vmem:[%s425_s3 + $0x18] sm:$0xff] }
   0x3   :  { %v302_v5 = vld [vmem:[%s425_s3 + $0x20] sm:$0xff]  ;;  %v300_v7 = vld [vmem:[%s425_s3 + $0x10] sm:$0xff]  ;;  %v299_v8 = vld [vmem:[%s425_s3 + $0x8] sm:$0xff] }
   0x4   :  { %v298_v9 = vld [vmem:[%s425_s3] sm:$0xff]  ;;  %v313_v10 = vld [vmem:[%s428_s5 + $0x38] sm:$0xff]  ;;  %v312_v11 = vld [vmem:[%s428_s5 + $0x30] sm:$0xff] }
   0x5   :  { %232 = vmatmul.msk.bf16.vlgmr.msra.gmra.mxu0 %vm40_vm0, %v27_v2  ;;  %210 = vmatpush.bf16.msra.mxu2 %v313_v10  ;;  %v311_v12 = vld [vmem:[%s428_s5 + $0x28] sm:$0xff]  ;;  %v310_v13 = vld [vmem:[%s428_s5 + $0x20] sm:$0xff]  ;;  %v309_v14 = vld [vmem:[%s428_s5 + $0x18] sm:$0xff] }
   0x6   :  { %128 = vmatpush.bf16.msra.mxu1 %v304_v3  ;;  %v308_v15 = vld [vmem:[%s428_s5 + $0x10] sm:$0xff]  ;;  %v314_v16 = vld [vmem:[%s426_s2] ss:$0 sm:$0xff]  ;;  %v307_v22 = vld [vmem:[%s428_s5 + $0x8] sm:$0xff] }
   0x7   :  { %v306_v23 = vld [vmem:[%s428_s5] sm:$0xff] }
   0x8   :  { %v315_v24 = vld [vmem:[%s427_s4] ss:$0 sm:$0xff] }
   0x9   :  { %211 = vmatpush.bf16.msra.mxu2 %v312_v11  ;;  %v316_v30 = vld [vmem:[%s429_s6] ss:$0 sm:$0xff] }
   0xa   :  { %129 = vmatpush.bf16.msra.mxu1 %v303_v4 }
   0xd   :  { %212 = vmatpush.bf16.msra.mxu2 %v311_v12 }
   0xe   :  { %130 = vmatpush.bf16.msra.mxu1 %v302_v5 }
  0x11   :  { %213 = vmatpush.bf16.msra.mxu2 %v310_v13 }
  0x12   :  { %131 = vmatpush.bf16.msra.mxu1 %v301_v6 }
  0x15   :  { %214 = vmatpush.bf16.msra.mxu2 %v309_v14 }
  0x16   :  { %132 = vmatpush.bf16.msra.mxu1 %v300_v7 }
  0x19   :  { %215 = vmatpush.bf16.msra.mxu2 %v308_v15 }
  0x1a   :  { %133 = vmatpush.bf16.msra.mxu1 %v299_v8 }
  0x1d   :  { %216 = vmatpush.bf16.msra.mxu2 %v307_v22 }
  0x1e   :  { %134 = vmatpush.bf16.msra.mxu1 %v298_v9 }
  0x21   :  { %217 = vmatpush.bf16.msra.mxu2 %v306_v23 }
  0x82   :  { %v53_v17 = vpop.f32.mrf.mxu0 }
  0x83   :  { %v54_v18 = vadd.f32 %v314_v16, %v53_v17 }
  0x85   :  { %v57_v19 = vmax.f32 %v54_v18, 0.0 }
  0x87   :  { %v58_v20 = vpack.c.bf16 %v57_v19, %v57_v19 }
  0x89   :  { %135 = vmatmul.bf16.vlgmr.msra.gmra.mxu1 %v58_v20 }
  0x8a   :  { %v55_v21 = vpop.f32.mrf.mxu0 }
 0x106   :  { %v136_v25 = vpop.f32.mrf.mxu1 }
 0x107   :  { %v137_v26 = vadd.f32 %v315_v24, %v136_v25 }
 0x109   :  { %v140_v27 = vmax.f32 %v137_v26, 0.0 }
 0x10b   :  { %v141_v28 = vpack.c.bf16 %v140_v27, %v140_v27 }
 0x10d   :  { %218 = vmatmul.bf16.vlgmr.msra.gmra.mxu2 %v141_v28 }
 0x10e   :  { %v138_v29 = vpop.f32.mrf.mxu1 }
 0x190   :  { %v219_v31 = vpop.f32.mrf.mxu2 }
 0x191   :  { %v220_v32 = vadd.f32 %v316_v30, %v219_v31 }
 0x193   :  { %223 = vst [vmem:[%s430_s7] sm:$0xff] %v220_v32 }
 0x198   :  { %v221_v33 = vpop.f32.mrf.mxu2 }

</bundles_post_ra>
